<compile_context>
chip_gen: v7x
topology: tpu7x:2x2x1
jax: 0.10.0
libtpu: 0.0.40
codegen_flags: <defaults>
</compile_context>

<pallas_src>
import functools

import jax
import jax.numpy as jnp
from jax import lax
from jax.experimental import pallas as pl
from jax.experimental.pallas import tpu as pltpu


def _round_up(x, m):
    return ((x + m - 1) // m) * m


def _single_buffered_spec(block_shape, index_map):
    """BlockSpec requesting a single pipeline buffer.

    The table's index_map is constant, so it is DMA'd once and stays resident;
    a second pipeline buffer would be pure VMEM waste (matters most on v7x's
    64 MiB VMEM per TensorCore)."""
    try:
        return pl.BlockSpec(block_shape, index_map, pipeline_mode=pl.Buffered(1))
    except (TypeError, AttributeError):   # older jax without pipeline_mode
        return pl.BlockSpec(block_shape, index_map)


# ---------------------------------------------------------------------------
# Path A: VMEM-resident table, sublane-group batched gather.
# ---------------------------------------------------------------------------
def _resident_gather_kernel(idx_ref, table_ref, out_ref, *, group):
    """idx_ref:   SMEM (chunk,) int32   -- scalar-prefetched token ids
    table_ref: VMEM (V, D_pad)       -- whole table, resident across the grid
    out_ref:   VMEM (n_tile, D_pad)  -- gathered rows for grid block i

    Rows are gathered `group` at a time (8 f32 / 16 bf16 / 32 int8) so every
    store to out_ref is a full, unmasked multi-sublane store instead of the
    masked 1-sublane stores a per-token loop would emit."""
    i = pl.program_id(0)
    n_tile = out_ref.shape[0]
    base = i * n_tile

    def body(g, carry):
        start = pl.multiple_of(g * group, group)
        rows = [table_ref[pl.ds(idx_ref[base + start + r], 1), :]
                for r in range(group)]
        out_ref[pl.ds(start, group), :] = jnp.concatenate(rows, axis=0)
        return carry

    lax.fori_loop(0, n_tile // group, body, 0)


def _gather_resident_chunk(idx_chunk, table_p, *, n_tile, group, vmem_limit):
    c = idx_chunk.shape[0]
    v, d_pad = table_p.shape
    kernel = functools.partial(_resident_gather_kernel, group=group)
    return pl.pallas_call(
        kernel,
        out_shape=jax.ShapeDtypeStruct((c, d_pad), table_p.dtype),
        grid_spec=pltpu.PrefetchScalarGridSpec(
            num_scalar_prefetch=1,                       # ids -> SMEM
            grid=(c // n_tile,),
            in_specs=[_single_buffered_spec((v, d_pad),
                                            lambda i, idx_ref: (0, 0))],
            out_specs=pl.BlockSpec((n_tile, d_pad), lambda i, idx_ref: (i, 0)),
        ),
        compiler_params=pltpu.CompilerParams(
            dimension_semantics=("parallel",),           # independent token blocks
            vmem_limit_bytes=vmem_limit,
        ),
    )(idx_chunk, table_p)


# ---------------------------------------------------------------------------
# Path B: table stays in HBM; windowed per-row DMA gather (large tables).
# ---------------------------------------------------------------------------
_DMA_WINDOW = 8   # outstanding row copies (prefetch depth)


def _hbm_row_gather_kernel(idx_ref, table_ref, out_ref, sem):
    """idx_ref:   SMEM (chunk,) int32   -- scalar-prefetched token ids
    table_ref: HBM  (V, D_pad)       -- memory_space=pl.ANY, never copied whole
    out_ref:   VMEM (n_tile, D_pad)  -- rows are DMA'd straight into here
    sem:       (W,)  DMA semaphores  -- one per in-flight row copy

    Only the rows that are actually referenced are read from HBM (n * D_pad
    bytes instead of the whole V * D_pad table)."""
    i = pl.program_id(0)
    n_tile = out_ref.shape[0]
    base = i * n_tile

    def issue(t):
        tok = idx_ref[base + t]
        pltpu.make_async_copy(table_ref.at[tok], out_ref.at[t],
                              sem.at[t % _DMA_WINDOW]).start()

    @pl.loop(0, min(_DMA_WINDOW, n_tile))
    def _prime(t):
        issue(t)

    @pl.loop(0, n_tile)
    def _collect(t):
        # The wait descriptor only needs matching shapes; src row 0 is fine.
        pltpu.make_async_copy(table_ref.at[0], out_ref.at[t],
                              sem.at[t % _DMA_WINDOW]).wait()
        nxt = t + _DMA_WINDOW

        @pl.when(nxt < n_tile)
        def _():
            issue(nxt)


def _gather_hbm_chunk(idx_chunk, table_p, *, n_tile, vmem_limit):
    c = idx_chunk.shape[0]
    _, d_pad = table_p.shape
    return pl.pallas_call(
        _hbm_row_gather_kernel,
        out_shape=jax.ShapeDtypeStruct((c, d_pad), table_p.dtype),
        grid_spec=pltpu.PrefetchScalarGridSpec(
            num_scalar_prefetch=1,                       # ids -> SMEM
            grid=(c // n_tile,),
            in_specs=[pl.BlockSpec(memory_space=pl.ANY)],
            out_specs=pl.BlockSpec((n_tile, d_pad), lambda i, idx_ref: (i, 0)),
            scratch_shapes=[pltpu.SemaphoreType.DMA((_DMA_WINDOW,))],
        ),
        compiler_params=pltpu.CompilerParams(
            dimension_semantics=("arbitrary",),
            vmem_limit_bytes=vmem_limit,
        ),
    )(idx_chunk, table_p)


# ---------------------------------------------------------------------------
# Wrapper: path selection, tiling, chunking.
# ---------------------------------------------------------------------------
def discrete_embedding(x, table, *, block_tokens=None, force_hbm_gather=False,
                       smem_chunk_tokens=32768):
    """Pallas equivalent of PyTorch `nn.Embedding(size, d_model)(x.long())`.

    NOTE: out-of-range ids are clamped to [0, size-1]; PyTorch would raise."""
    orig_shape = x.shape
    v, d = table.shape
    itemsize = jnp.dtype(table.dtype).itemsize

    idx = jnp.clip(x.astype(jnp.int32).reshape(-1), 0, v - 1)        # (N,)
    n = int(idx.shape[0])

    d_pad = _round_up(d, 128)                     # lane-dense output stores
    table_p = jnp.pad(table, ((0, 0), (0, d_pad - d))) if d_pad != d else table

    # Generation-aware VMEM budget (v7x: 64 MiB / TensorCore; v5e/v6e: 128 MiB).
    try:
        vmem_physical = int(pltpu.get_tpu_info().vmem_capacity_bytes)
    except Exception:                             # conservative (v7x) fallback
        vmem_physical = 64 << 20
    vmem_cap = max(vmem_physical - (8 << 20), 16 << 20)

    # Token tile: multiple of the packed sublane group (8 f32 / 16 bf16 /
    # 32 int8), larger on v5e/v6e (more VMEM), smaller on v7x.
    group = max(8, 32 // max(itemsize, 1))
    if block_tokens is None:
        block_tokens = 1024 if vmem_physical >= (100 << 20) else 512
    n_tile = _round_up(max(int(block_tokens), group), group)
    n_tile = min(n_tile, _round_up(n, group))
    out_block_cap = max(group, ((8 << 20) // (d_pad * itemsize)) // group * group)
    n_tile = min(n_tile, out_block_cap)

    table_bytes = v * d_pad * itemsize
    out_block_bytes = n_tile * d_pad * itemsize
    out_total_bytes = n * d_pad * itemsize

    # Resident path needs the single-buffered table plus double-buffered output
    # blocks in scoped VMEM.
    resident_need = table_bytes + 2 * out_block_bytes + (2 << 20)
    # For short token streams on big tables the full-table HBM->VMEM copy
    # dominates (and is paid per TensorCore with a parallel grid), so prefer the
    # row gather that only touches the rows actually used.
    prefer_hbm = table_bytes > (2 << 20) and table_bytes > out_total_bytes

    use_resident = (not force_hbm_gather
                    and resident_need <= vmem_cap
                    and not prefer_hbm)

    # Flatten/pad ids; chunk so one call never prefetches a huge 1D SMEM array
    # (1D SMEM pads to next_pow2(4N) bytes).
    n_pad = _round_up(n, n_tile)
    idx_p = jnp.pad(idx, (0, n_pad - n))          # pad ids = 0 (valid row)
    chunk = min(n_pad, _round_up(max(smem_chunk_tokens, n_tile), n_tile))

    if use_resident:
        vmem_limit = int(min(max(resident_need + (2 << 20), 32 << 20), vmem_cap))
        call = functools.partial(_gather_resident_chunk, table_p=table_p,
                                 n_tile=n_tile, group=group,
                                 vmem_limit=vmem_limit)
    else:
        vmem_limit = int(min(max(2 * out_block_bytes + (4 << 20), 32 << 20),
                             vmem_cap))
        call = functools.partial(_gather_hbm_chunk, table_p=table_p,
                                 n_tile=n_tile, vmem_limit=vmem_limit)

    pieces = [call(idx_p[s:s + chunk]) for s in range(0, n_pad, chunk)]
    out = pieces[0] if len(pieces) == 1 else jnp.concatenate(pieces, axis=0)

    return out[:n, :d].reshape(*orig_shape, d)


if __name__ == "__main__":
    key = jax.random.PRNGKey(0)
    k_tab1, k_idx1, k_tab2, k_idx2, k_tab3, k_idx3 = jax.random.split(key, 6)

    B, S = 2, 8

    # 1) Small discrete vocab (timestep / modality / camera embedding):
    #    VMEM-resident table, sublane-grouped gather, multi-block grid.
    size1, d_model1 = 16, 32
    table1 = jax.random.normal(k_tab1, (size1, d_model1), dtype=jnp.float32)
    x1 = jax.random.randint(k_idx1, (B, S), 0, size1, dtype=jnp.int32)
    out1 = jax.block_until_ready(discrete_embedding(x1, table1, block_tokens=8))
    assert out1.shape == (B, S, d_model1) and out1.dtype == jnp.float32
    assert bool(jnp.array_equal(out1, table1[x1])), "resident-path mismatch"

    # 2) HBM row-gather path (what large vocabularies use, esp. on v7x), forced
    #    here so the small example exercises it end to end.
    size2, d_model2 = 64, 32
    table2 = jax.random.normal(k_tab2, (size2, d_model2), dtype=jnp.float32)
    x2 = jax.random.randint(k_idx2, (B, S), 0, size2, dtype=jnp.int32)
    out2 = jax.block_until_ready(
        discrete_embedding(x2, table2, block_tokens=8, force_hbm_gather=True))
    assert out2.shape == (B, S, d_model2)
    assert bool(jnp.array_equal(out2, table2[x2])), "hbm-path mismatch"

    # 3) bf16 table: packed-sublane store group of 16 rows.
    size3, d_model3 = 24, 32
    table3 = jax.random.normal(k_tab3, (size3, d_model3)).astype(jnp.bfloat16)
    x3 = jax.random.randint(k_idx3, (B, S), 0, size3, dtype=jnp.int32)
    out3 = jax.block_until_ready(discrete_embedding(x3, table3))
    assert out3.shape == (B, S, d_model3) and out3.dtype == jnp.bfloat16
    assert bool(jnp.array_equal(out3, table3[x3])), "bf16-path mismatch"

    print("KERNEL_OK")
</pallas_src>

<mosaic_0001>
module attributes {stable_mosaic.version = 11 : i64} {
  func.func @_resident_gather_kernel(%arg0: i32, %arg1: memref<16xi32, #tpu.memory_space<smem>>, %arg2: memref<16x128xf32, #tpu.memory_space<vmem>>, %arg3: memref<8x128xf32, #tpu.memory_space<vmem>>) attributes {dimension_semantics = [#tpu.dimension_semantics<parallel>], iteration_bounds = array<i64: 2>, scalar_prefetch = 1 : i64, scratch_operands = 0 : i64, tpu.core_type = #tpu.core_type<tc>, window_params = [{pipeline_mode = #tpu.pipeline_mode<synchronous>, transform_indices = @transform_0, window_bounds = array<i64: 16, 128>}, {transform_indices = @transform_1, window_bounds = array<i64: 8, 128>}]} {
    %c8_i32 = arith.constant 8 : i32
    %0 = arith.muli %arg0, %c8_i32 : i32
    %c0_i32 = arith.constant 0 : i32
    %c8_i32_0 = arith.constant 8 : i32
    %1 = arith.muli %c0_i32, %c8_i32_0 : i32
    %2 = tpu.assume_multiple %1, 8 : i32
    %3 = arith.addi %0, %2 : i32
    %c0_i32_1 = arith.constant 0 : i32
    %4 = arith.addi %3, %c0_i32_1 : i32
    %5 = arith.index_cast %4 : i32 to index
    %6 = memref.load %arg1[%5] : memref<16xi32, #tpu.memory_space<smem>>
    %7 = arith.index_cast %6 : i32 to index
    %c0 = arith.constant 0 : index
    %8 = vector.load %arg2[%7, %c0] : memref<16x128xf32, #tpu.memory_space<vmem>>, vector<1x128xf32>
    %9 = arith.addi %0, %2 : i32
    %c1_i32 = arith.constant 1 : i32
    %10 = arith.addi %9, %c1_i32 : i32
    %11 = arith.index_cast %10 : i32 to index
    %12 = memref.load %arg1[%11] : memref<16xi32, #tpu.memory_space<smem>>
    %13 = arith.index_cast %12 : i32 to index
    %c0_2 = arith.constant 0 : index
    %14 = vector.load %arg2[%13, %c0_2] : memref<16x128xf32, #tpu.memory_space<vmem>>, vector<1x128xf32>
    %15 = arith.addi %0, %2 : i32
    %c2_i32 = arith.constant 2 : i32
    %16 = arith.addi %15, %c2_i32 : i32
    %17 = arith.index_cast %16 : i32 to index
    %18 = memref.load %arg1[%17] : memref<16xi32, #tpu.memory_space<smem>>
    %19 = arith.index_cast %18 : i32 to index
    %c0_3 = arith.constant 0 : index
    %20 = vector.load %arg2[%19, %c0_3] : memref<16x128xf32, #tpu.memory_space<vmem>>, vector<1x128xf32>
    %21 = arith.addi %0, %2 : i32
    %c3_i32 = arith.constant 3 : i32
    %22 = arith.addi %21, %c3_i32 : i32
    %23 = arith.index_cast %22 : i32 to index
    %24 = memref.load %arg1[%23] : memref<16xi32, #tpu.memory_space<smem>>
    %25 = arith.index_cast %24 : i32 to index
    %c0_4 = arith.constant 0 : index
    %26 = vector.load %arg2[%25, %c0_4] : memref<16x128xf32, #tpu.memory_space<vmem>>, vector<1x128xf32>
    %27 = arith.addi %0, %2 : i32
    %c4_i32 = arith.constant 4 : i32
    %28 = arith.addi %27, %c4_i32 : i32
    %29 = arith.index_cast %28 : i32 to index
    %30 = memref.load %arg1[%29] : memref<16xi32, #tpu.memory_space<smem>>
    %31 = arith.index_cast %30 : i32 to index
    %c0_5 = arith.constant 0 : index
    %32 = vector.load %arg2[%31, %c0_5] : memref<16x128xf32, #tpu.memory_space<vmem>>, vector<1x128xf32>
    %33 = arith.addi %0, %2 : i32
    %c5_i32 = arith.constant 5 : i32
    %34 = arith.addi %33, %c5_i32 : i32
    %35 = arith.index_cast %34 : i32 to index
    %36 = memref.load %arg1[%35] : memref<16xi32, #tpu.memory_space<smem>>
    %37 = arith.index_cast %36 : i32 to index
    %c0_6 = arith.constant 0 : index
    %38 = vector.load %arg2[%37, %c0_6] : memref<16x128xf32, #tpu.memory_space<vmem>>, vector<1x128xf32>
    %39 = arith.addi %0, %2 : i32
    %c6_i32 = arith.constant 6 : i32
    %40 = arith.addi %39, %c6_i32 : i32
    %41 = arith.index_cast %40 : i32 to index
    %42 = memref.load %arg1[%41] : memref<16xi32, #tpu.memory_space<smem>>
    %43 = arith.index_cast %42 : i32 to index
    %c0_7 = arith.constant 0 : index
    %44 = vector.load %arg2[%43, %c0_7] : memref<16x128xf32, #tpu.memory_space<vmem>>, vector<1x128xf32>
    %45 = arith.addi %0, %2 : i32
    %c7_i32 = arith.constant 7 : i32
    %46 = arith.addi %45, %c7_i32 : i32
    %47 = arith.index_cast %46 : i32 to index
    %48 = memref.load %arg1[%47] : memref<16xi32, #tpu.memory_space<smem>>
    %49 = arith.index_cast %48 : i32 to index
    %c0_8 = arith.constant 0 : index
    %50 = vector.load %arg2[%49, %c0_8] : memref<16x128xf32, #tpu.memory_space<vmem>>, vector<1x128xf32>
    %51 = tpu.concatenate %8, %14, %20, %26, %32, %38, %44, %50 in 0 : vector<1x128xf32>, vector<1x128xf32>, vector<1x128xf32>, vector<1x128xf32>, vector<1x128xf32>, vector<1x128xf32>, vector<1x128xf32>, vector<1x128xf32> -> vector<8x128xf32>
    %52 = arith.index_cast %2 : i32 to index
    %c0_9 = arith.constant 0 : index
    %53 = vector.load %arg3[%52, %c0_9] : memref<8x128xf32, #tpu.memory_space<vmem>>, vector<8x128xf32>
    tpu.vector_store %arg3[%52, %c0_9], %51 {strides = array<i32>} : memref<8x128xf32, #tpu.memory_space<vmem>>, vector<8x128xf32>,
    %c1_i32_10 = arith.constant 1 : i32
    return
  }
  func.func @transform_0(%arg0: i32, %arg1: memref<16xi32, #tpu.memory_space<smem>>) -> (i32, i32) {
    %c0_i32 = arith.constant 0 : i32
    %c0_i32_0 = arith.constant 0 : i32
    %c0_i32_1 = arith.constant 0 : i32
    return %c0_i32, %c0_i32_0 : i32, i32
  }
  func.func @transform_1(%arg0: i32, %arg1: memref<16xi32, #tpu.memory_space<smem>>) -> (i32, i32) {
    %c0_i32 = arith.constant 0 : i32
    %c0_i32_0 = arith.constant 0 : i32
    return %arg0, %c0_i32 : i32, i32
  }
}

</mosaic_0001>

<bundles_post_ra>
// kernel: tpu_custom_call.1
= control target key start
LH: loop header
LB: loop body
LE: loop exit
PB: predicated region body
PF: predicated region fallthrough
CT: control target
= control target key end

     0   :  { %s614_s0 = inlined_call_operand.hbm [shape: s32[16], index: 0, kind: input, shape index: {}]   ;;  %s615_s1 = inlined_call_operand.hbm [shape: f32[16,128], index: 1, kind: input, shape index: {}]   ;;  %s616_s2 = inlined_call_operand.hbm [shape: f32[16,128], index: 2, kind: output, shape index: {}]  }
   0x1   :  { %s329_s11 = scalar_lea.hbm %s614_s0, 16 }
   0x2   :  { %p330_p0 = scmp.ne.s32.totalorder %s614_s0, %s329_s11  ;;  %p333_p1 = scmp.lt.u32.totalorder %s329_s11, %s614_s0 }
   0x4   :  { %p335_p2 = pnand %p333_p1, %p330_p0 }
   0x6   :  { %338 = shalt.err (!%p335_p2)  }
   0x7   :  { %s437_s16 = smov [#allocation3]  }
   0x8   :  { %8 = dma.hbm_to_smem %s614_s0, 16, %s437_s16, [#allocation2] }
   0x9   :  { %411 = dma.done.wait [#allocation2], 16 }
   0xa   :  { %412 = vsyncadd [#allocation2], 4294967280 }
   0xb   :  { %10 = sfence }
   0xc   :  { %11 = vsyncpa [#allocation5], 0 }
   0xd   :  { %12 = vsyncpa [#allocation6], 0 }
   0xe   :  { %14 = vsyncpa [#allocation6 + $0x1], 0  ;;  %s469_s19 = smov 0   ;;  %s471_s20 = smov 0  }
   0xf   :  { %s473_s21 = smov 0   ;;  %s475_s22 = smov 0  }
  0x10 LB: > { %s490_s0 = sadd.s32 4294967295, %s435_s22   ;;  %s265_s23 = sadd.s32 4294967294, %s435_s22   ;;  %s435_s22 = sphi %s475_s22, %s632_s22   ;;  %s431_s21 = sphi %s473_s21, %s631_s21   ;;  %s427_s20 = sphi %s471_s20, %s630_s20   ;;  %s423_s19 = sphi %s469_s19, %s629_s19  }
  0x11   : > { %s494_s24 = sadd.s32 1, %s435_s22   ;;  %s48_s25 = sadd.s32 1, %s431_s21 }
  0x12   : > { %s45_s26 = ssub.s32 %s435_s22, %s494_s24  ;;  %p58_p3 = scmp.ne.s32.totalorder %s431_s21, %s427_s20 }
  0x13   : > { %p46_p4 = scmp.eq.s32.totalorder %s45_s26, 0  ;;  %p59_p5 = scmp.eq.s32.totalorder %s490_s0, 1 }
  0x14   : > { %p64_p6 = scmp.ne.s32.totalorder %s427_s20, %s423_s19  ;;  %p65_p7 = scmp.eq.s32.totalorder %s265_s23, 1 }
  0x15   : > { %s505_s27 = scalar_select %p46_p4, %s431_s21, %s48_s25  }
  0x16   : > { %p507_p8 = por %p59_p5, %p58_p3  ;;  %p511_p9 = por %p65_p7, %p64_p6 }
  0x17   : > { %p266_p10 = scmp.ge.s32.totalorder %s435_s22, 1  ;;  %p72_p11 = scmp.lt.s32.totalorder %s435_s22, 3 }
  0x18   : > { %s620_s28 = scalar_select %p507_p8, 1, 0 }
  0x19   : > { %s621_s29 = scalar_select %p511_p9, 1, 0 }
  0x1a   : > { %p617_p12 = scmp.eq.s32.totalorder %s490_s0, 0  ;;  %p518_p13 = pnand %p266_p10, %p72_p11 }
  0x1b   : > { %s438_s3 = smov [#allocation4]   ;;  %s339_s8 = scalar_lea.hbm %s615_s1, 256 }
  0x1c   : > { %s622_s30 = scalar_select %p518_p13, 1, 0 }
  0x1d   : > { %s84_s4 = sshll.u32 %s438_s3, 4  ;;  %p282_p0 = pneg %p518_p13  ;;  %s85_s4 = int_to_ptr.vmem [resolvable:$true] %s84_s4 }
  0x1e   : > { %p340_p2 = scmp.ne.s32.totalorder %s615_s1, %s339_s8  ;;  %p346_p6 = scmp.lt.u32.totalorder %s339_s8, %s615_s1 }
  0x1f   : > { %p526_p1 = pnand %p617_p12, %p282_p0 }
  0x21   : > { %p341_p3 = pneg %p526_p1 }
  0x23   : > { %p342_p4 = pnand %p341_p3, %p340_p2 }
  0x25   : > { %p343_p5 = pneg %p342_p4 }
  0x27   : > { %p348_p7 = pnand %p346_p6, %p343_p5 }
  0x29   : > { %351 = shalt.err (!%p348_p7)
}
  0x2a   : > { %s352_s13 = scalar_lea.vmem %s85_s4, 256  ;;  %p360_p12 = scmp.lt.s32.totalorder %s85_s4, %s85_s4 }
  0x2b   : > { %p353_p10 = scmp.ne.s32.totalorder %s85_s4, %s352_s13  ;;  %p361_p9 = scmp.lt.s32.totalorder %s352_s13, %s352_s13 }
  0x2d   : > { %p355_p11 = pnand %p353_p10, %p341_p3  ;;  %p362_p8 = por %p361_p9, %p360_p12 }
  0x2f   : > { %p356_p0 = pneg %p355_p11 }
  0x31   : > { %p363_p13 = pnand %p362_p8, %p356_p0 }
  0x33   : > { %366 = shalt.err (!%p363_p13)
}
  0x34   : > { %s439_s14 = smov 128   ;;  %s440_s15 = smov 8  }
  0x35   : > { %285 = dma.hbm_to_vmem [thread:$0]  (!%p526_p1), %s615_s1, 256, %s85_s4, [#allocation5], %s439_s14, %s439_s14, %s440_s15  }
  0x36   : > { %p624_p2 = scmp.ne.s32.totalorder %s622_s30, 0 }
  0x37   : > { %p625_p4 = scmp.eq.s32.totalorder (!%p624_p2), %s490_s0, 0 }
  0x38   : > { %100 = sbr.rel (%p624_p2) target bundleno = 103 (0x67), region = 24 }
  0x3f   : > { %414 = dma.done.wait (%p625_p4), [#allocation5], 256   ;;  %p626_p3 = pmov %p625_p4 }
  0x40   : > { %s112_s18 = sand.u32 1, %s427_s20   ;;  %s271_s23 = sshll.u32 %s490_s0, 3  ;;  %vm169_vm0 = vcmask 1040384   ;;  %vm171_vm1 = vcmask 1041408   ;;  %vm173_vm2 = vcmask 1042432   ;;  %vm175_vm3 = vcmask 1043456  }
  0x41   : > { %416 = vsyncadd (%p626_p3), [#allocation5], 4294967040  ;;  %s117_s25 = sld [smem:[#allocation3 + %s271_s23]]  ;;  %s556_s26 = sshll.u32 %s112_s18, 3  ;;  %vm177_vm4 = vcmask 1044480   ;;  %vm179_vm5 = vcmask 1045504  }
  0x42   : > { %s120_s3 = sadd.s32 1, %s271_s23  ;;  %s124_s5 = sadd.s32 2, %s271_s23  ;;  %vm181_vm6 = vcmask 1046528  }
  0x43   : > { %s121_s4 = sld [smem:[#allocation3 + %s120_s3]]  ;;  %s128_s6 = sadd.s32 3, %s271_s23 }
  0x44   : > { %s125_s30 = sld [smem:[#allocation3 + %s124_s5]]  ;;  %s132_s8 = sadd.s32 4, %s271_s23 }
  0x45   : > { %s129_s7 = sld [smem:[#allocation3 + %s128_s6]]  ;;  %s136_s10 = sadd.s32 5, %s271_s23 }
  0x46   : > { %s133_s9 = sld [smem:[#allocation3 + %s132_s8]]  ;;  %s140_s12 = sadd.s32 6, %s271_s23 }
  0x47   : > { %s137_s11 = sld [smem:[#allocation3 + %s136_s10]]  ;;  %s144_s13 = sadd.s32 7, %s271_s23 }
  0x48   : > { %s558_s14 = sld [smem:[#allocation3 + %s140_s12]]  ;;  %s118_s15 = scalar_lea.vmem [#allocation4], %s117_s25 }
  0x49   : > { %v119_v0 = vld [vmem:[%s118_s15] sm:$0x1]  ;;  %s122_s16 = scalar_lea.vmem [#allocation4], %s121_s4  ;;  %s560_s17 = sld [smem:[#allocation3 + %s144_s13]] }
  0x4a   : > { %v123_v1 = vld [vmem:[%s122_s16] sm:$0x1]  ;;  %s126_s3 = scalar_lea.vmem [#allocation4], %s125_s30  ;;  %s114_s4 = scalar_lea.vmem [#allocation7], %s556_s26 }
  0x4b   : > { %v127_v2 = vld [vmem:[%s126_s3] sm:$0x1]  ;;  %v149_v3 = vrot.slane %v123_v1, 7  ;;  %s130_s5 = scalar_lea.vmem [#allocation4], %s129_s7  ;;  %s198_s30 = sshll.u32 %s114_s4, 4  ;;  %s567_s30 = int_to_ptr.vmem [resolvable:$true] %s198_s30 }
  0x4c   : > { %v131_v4 = vld [vmem:[%s130_s5] sm:$0x1]  ;;  %v152_v5 = vrot.slane %v127_v2, 6  ;;  %s134_s23 = scalar_lea.vmem [#allocation4], %s133_s9  ;;  %s273_s7 = sshll.u32 %s490_s0, 7 }
  0x4d   : > { %v135_v6 = vld [vmem:[%s134_s23] sm:$0x1]  ;;  %v155_v7 = vrot.slane %v131_v4, 5  ;;  %v170_v8 = vsel %vm169_vm0, %v119_v0, %v149_v3  ;;  %s138_s25 = scalar_lea.vmem [#allocation4], %s137_s11  ;;  %s572_s26 = scalar_lea.hbm %s616_s2, %s273_s7 }
  0x4e   : > { %v139_v9 = vld [vmem:[%s138_s25] sm:$0x1]  ;;  %v158_v10 = vrot.slane %v135_v6, 4  ;;  %v172_v11 = vsel %vm171_vm1, %v170_v8, %v152_v5  ;;  %s142_s6 = scalar_lea.vmem [#allocation4], %s558_s14  ;;  %s185_s0 = scalar_lea.sflag [#allocation6], %s112_s18 }
  0x4f   : > { %v161_v12 = vrot.slane %v139_v9, 3  ;;  %v174_v13 = vsel %vm173_vm2, %v172_v11, %v155_v7  ;;  %v143_v14 = vld [vmem:[%s142_s6] sm:$0x1]  ;;  %s146_s8 = scalar_lea.vmem [#allocation4], %s560_s17  ;;  %s367_s11 = scalar_lea.vmem %s567_s30, 128 }
  0x50   : > { %v176_v15 = vsel %vm175_vm3, %v174_v13, %v158_v10  ;;  %v147_v16 = vld [vmem:[%s146_s8] sm:$0x1]  ;;  %v164_v17 = vrot.slane %v143_v14, 2  ;;  %p368_p8 = scmp.ne.s32.totalorder %s567_s30, %s367_s11  ;;  %p627_p9 = scmp.ne.s32.totalorder %s620_s28, 0 }
  0x51   : > { %v178_v18 = vsel %vm177_vm4, %v176_v15, %v161_v12  ;;  %v167_v19 = vrot.slane %v147_v16, 1  ;;  %s441_s12 = smov [#allocation7]  }
  0x52   : > { %v180_v20 = vsel %vm179_vm5, %v178_v18, %v164_v17  ;;  %p369_p12 = pnand %p368_p8, %p627_p9  ;;  %s371_s13 = sshll.u32 %s441_s12, 4  ;;  %s372_s13 = int_to_ptr.vmem [resolvable:$false] %s371_s13 }
  0x53   : > { %v182_v21 = vsel %vm181_vm6, %v180_v20, %v167_v19  ;;  %s373_s14 = scalar_lea.vmem %s372_s13, 256  ;;  %p374_p1 = scmp.lt.s32.totalorder %s567_s30, %s372_s13 }
  0x54   : > { %183 = vst [vmem:[%s114_s4] sm:$0xff] %v182_v21  ;;  %p370_p13 = pneg %p369_p12  ;;  %p375_p5 = scmp.lt.s32.totalorder %s373_s14, %s367_s11 }
  0x56   : > { %p376_p6 = por %p375_p5, %p374_p1 }
  0x58   : > { %p377_p7 = pnand %p376_p6, %p370_p13 }
  0x5a   : > { %380 = shalt.err (!%p377_p7)
}
  0x5b   : > { %s381_s18 = scalar_lea.hbm %s572_s26, 128  ;;  %s385_s17 = scalar_lea.hbm %s616_s2, 256 }
  0x5c   : > { %p382_p10 = scmp.ne.s32.totalorder %s572_s26, %s381_s18  ;;  %p386_p2 = scmp.lt.u32.totalorder %s572_s26, %s616_s2 }
  0x5d   : > { %p387_p4 = scmp.lt.u32.totalorder %s385_s17, %s381_s18  ;;  %p389_p8 = scmp.lt.u32.totalorder %s381_s18, %s572_s26 }
  0x5e   : > { %p383_p11 = pnand %p382_p10, %p627_p9 }
  0x5f   : > { %p388_p3 = por %p387_p4, %p386_p2 }
  0x60   : > { %p384_p0 = pneg %p383_p11 }
  0x61   : > { %p390_p12 = por %p389_p8, %p388_p3 }
  0x63   : > { %p391_p13 = pnand %p390_p12, %p384_p0 }
  0x65   : > { %394 = shalt.err (!%p391_p13)
}
  0x66   : > { %280 = dma.vmem_to_hbm [thread:$0]  (%p627_p9), %s567_s30, 128, %s572_s26, %s185_s0  }
  0x67 PF: > { %p292_p1 = scmp.ge.s32.totalorder %s435_s22, 2  ;;  %s210_s23 = sand.u32 1, %s423_s19  }
  0x68   : > { %p628_p5 = scmp.ne.s32.totalorder %s621_s29, 0  ;;  %s211_s25 = scalar_lea.sflag [#allocation6], %s210_s23 }
  0x6a   : > { %p287_p6 = pnand %p292_p1, %p628_p5 }
  0x6c   : > { %418 = dma.done.wait (!%p287_p6), %s211_s25, 128  }
  0x6d   : > { %420 = vsyncadd (!%p287_p6), %s211_s25, 4294967168  ;;  %p17_p7 = scmp.ge.s32.totalorder %s494_s24, 4   ;;  %s629_s19 = smov %s427_s20 }
  0x6e   : > { %s630_s20 = smov %s431_s21  ;;  %s631_s21 = smov %s505_s27 }
  0x6f   : > { %s632_s22 = smov %s494_s24  ;;  %19 = sbr.rel (!%p17_p7) target bundleno = 16 (0x10), region = 69 }
  0x76   :  { %216 = vsyncpa [#allocation5], 1 }
  0x77   :  { %218 = vsyncpa [#allocation5 + $0x1], 1 }
  0x78   :  { %219 = vsyncpa [#allocation6], 1 }
  0x79   :  { %221 = vsyncpa [#allocation6 + $0x1], 1 }

</bundles_post_ra>
